<compile_context>
chip_gen: v7x
topology: tpu7x:2x2x1
jax: 0.10.0
libtpu: 0.0.40
codegen_flags: <defaults>
</compile_context>

<pallas_src>
import jax
import jax.numpy as jnp
from jax.experimental import pallas as pl
from jax.experimental.pallas import tpu as pltpu

_TARGET_BLOCK_BYTES = 2 * 1024 * 1024          # ~2 MiB per block (native dtype)
_WIDTH_CANDIDATES = (4096, 2048, 1024, 512, 256, 128)


def _mish_kernel(x_ref, o_ref):
    # Load in native dtype, compute in f32 (v5e has no bf16 VPU/EUP).
    x = x_ref[...].astype(jnp.float32)
    t = jnp.exp(-jnp.abs(x))                   # single EUP op, t in (0, 1]
    pos = x >= 0.0
    # x >= 0:  ratio = (1 + 2t) / (1 + 2t + 2t^2)          (t = e^{-x})
    # x <  0:  ratio = t(t + 2) / (t^2 + 2t + 2)           (t = e^{x})
    num = jnp.where(pos, 1.0 + 2.0 * t, t * (t + 2.0))
    den = jnp.where(pos, 1.0 + 2.0 * t + 2.0 * t * t, t * t + 2.0 * t + 2.0)
    o_ref[...] = (x * (num / den)).astype(o_ref.dtype)


def mish(x):
    orig_shape = x.shape
    orig_dtype = x.dtype
    n = x.size
    flat = x.reshape(-1)

    # Pick the widest lane dimension that divides n -> no padding pass needed
    # in the common aligned case.
    width = None
    for w in _WIDTH_CANDIDATES:
        if n % w == 0:
            width = w
            break
    padded = width is None
    if padded:
        width = 1024
        n_pad = ((n + width - 1) // width) * width
        flat = jnp.pad(flat, (0, n_pad - n))
    else:
        n_pad = n

    rows = n_pad // width
    x2d = flat.reshape(rows, width)

    # ~2 MiB blocks (in native dtype); rows per block multiple of 8, or the
    # full row extent for small inputs.
    itemsize = x.dtype.itemsize
    tile_rows = _TARGET_BLOCK_BYTES // (width * itemsize)
    tile_rows = max(8, (tile_rows // 8) * 8)
    if tile_rows >= rows:
        tile_rows = rows                       # block == full dim (always legal)

    grid = (pl.cdiv(rows, tile_rows),)         # ragged last block handled by Pallas

    out2d = pl.pallas_call(
        _mish_kernel,
        out_shape=jax.ShapeDtypeStruct((rows, width), orig_dtype),
        grid_spec=pltpu.PrefetchScalarGridSpec(
            num_scalar_prefetch=0,
            grid=grid,
            in_specs=[pl.BlockSpec((tile_rows, width), lambda i: (i, 0))],
            out_specs=pl.BlockSpec((tile_rows, width), lambda i: (i, 0)),
        ),
        compiler_params=pltpu.CompilerParams(
            dimension_semantics=("parallel",),
        ),
    )(x2d)

    out = out2d.reshape(-1)
    if padded:
        out = out[:n]
    return out.reshape(orig_shape)


def _mish_ref(x):
    # pure-JAX reference (matches torch: x * tanh(softplus(x)))
    return x * jnp.tanh(jax.nn.softplus(x))


if __name__ == "__main__":
    key = jax.random.PRNGKey(0)

    # Primary case: NCHW-like, aligned (2*4*16*16 = 2048 elements).
    x = jax.random.normal(key, (2, 4, 16, 16), dtype=jnp.float32) * 4.0
    y = jax.block_until_ready(mish(x))
    y_ref = _mish_ref(x)
    assert y.shape == x.shape and y.dtype == x.dtype
    assert jnp.allclose(y, y_ref, atol=1e-5, rtol=1e-5)

    # Ragged / non-128-aligned case exercises the padding fallback path.
    x2 = jax.random.normal(jax.random.PRNGKey(1), (3, 5, 7), dtype=jnp.float32) * 6.0
    y2 = jax.block_until_ready(mish(x2))
    assert y2.shape == x2.shape and y2.dtype == x2.dtype
    assert jnp.allclose(y2, _mish_ref(x2), atol=1e-5, rtol=1e-5)

    print("KERNEL_OK")
</pallas_src>

<mosaic_0001>
module attributes {stable_mosaic.version = 11 : i64} {
  func.func @_mish_kernel(%arg0: i32, %arg1: memref<1x2048xf32, #tpu.memory_space<vmem>>, %arg2: memref<1x2048xf32, #tpu.memory_space<vmem>>) attributes {dimension_semantics = [#tpu.dimension_semantics<parallel>], iteration_bounds = array<i64: 1>, scalar_prefetch = 0 : i64, scratch_operands = 0 : i64, tpu.core_type = #tpu.core_type<tc>, window_params = [{transform_indices = @transform_0, window_bounds = array<i64: 1, 2048>}, {transform_indices = @transform_1, window_bounds = array<i64: 1, 2048>}]} {
    %c0 = arith.constant 0 : index
    %c0_0 = arith.constant 0 : index
    %0 = vector.load %arg1[%c0, %c0_0] : memref<1x2048xf32, #tpu.memory_space<vmem>>, vector<1x2048xf32>
    %1 = math.absf %0 : vector<1x2048xf32>
    %cst = arith.constant 0.000000e+00 : f32
    %2 = vector.broadcast %cst : f32 to vector<1x2048xf32>
    %3 = arith.subf %2, %1 : vector<1x2048xf32>
    %4 = math.exp %3 : vector<1x2048xf32>
    %cst_1 = arith.constant 0.000000e+00 : f32
    %5 = vector.broadcast %cst_1 : f32 to vector<1x2048xf32>
    %6 = arith.cmpf oge, %0, %5 : vector<1x2048xf32>
    %cst_2 = arith.constant 2.000000e+00 : f32
    %7 = vector.broadcast %cst_2 : f32 to vector<1x2048xf32>
    %8 = arith.mulf %7, %4 : vector<1x2048xf32>
    %cst_3 = arith.constant 1.000000e+00 : f32
    %9 = vector.broadcast %cst_3 : f32 to vector<1x2048xf32>
    %10 = arith.addf %9, %8 : vector<1x2048xf32>
    %cst_4 = arith.constant 2.000000e+00 : f32
    %11 = vector.broadcast %cst_4 : f32 to vector<1x2048xf32>
    %12 = arith.addf %4, %11 : vector<1x2048xf32>
    %13 = arith.mulf %4, %12 : vector<1x2048xf32>
    %14 = arith.select %6, %10, %13 : vector<1x2048xi1>, vector<1x2048xf32>
    %cst_5 = arith.constant 2.000000e+00 : f32
    %15 = vector.broadcast %cst_5 : f32 to vector<1x2048xf32>
    %16 = arith.mulf %15, %4 : vector<1x2048xf32>
    %cst_6 = arith.constant 1.000000e+00 : f32
    %17 = vector.broadcast %cst_6 : f32 to vector<1x2048xf32>
    %18 = arith.addf %17, %16 : vector<1x2048xf32>
    %cst_7 = arith.constant 2.000000e+00 : f32
    %19 = vector.broadcast %cst_7 : f32 to vector<1x2048xf32>
    %20 = arith.mulf %19, %4 : vector<1x2048xf32>
    %21 = arith.mulf %20, %4 : vector<1x2048xf32>
    %22 = arith.addf %18, %21 : vector<1x2048xf32>
    %23 = arith.mulf %4, %4 : vector<1x2048xf32>
    %cst_8 = arith.constant 2.000000e+00 : f32
    %24 = vector.broadcast %cst_8 : f32 to vector<1x2048xf32>
    %25 = arith.mulf %24, %4 : vector<1x2048xf32>
    %26 = arith.addf %23, %25 : vector<1x2048xf32>
    %cst_9 = arith.constant 2.000000e+00 : f32
    %27 = vector.broadcast %cst_9 : f32 to vector<1x2048xf32>
    %28 = arith.addf %26, %27 : vector<1x2048xf32>
    %29 = arith.select %6, %22, %28 : vector<1x2048xi1>, vector<1x2048xf32>
    %30 = arith.divf %14, %29 : vector<1x2048xf32>
    %31 = arith.mulf %0, %30 : vector<1x2048xf32>
    %c0_10 = arith.constant 0 : index
    %c0_11 = arith.constant 0 : index
    %32 = vector.load %arg2[%c0_10, %c0_11] : memref<1x2048xf32, #tpu.memory_space<vmem>>, vector<1x2048xf32>
    tpu.vector_store %arg2[%c0_10, %c0_11], %31 {strides = array<i32>} : memref<1x2048xf32, #tpu.memory_space<vmem>>, vector<1x2048xf32>,
    return
  }
  func.func @transform_0(%arg0: i32) -> (i32, i32) {
    %c0_i32 = arith.constant 0 : i32
    %c0_i32_0 = arith.constant 0 : i32
    return %arg0, %c0_i32 : i32, i32
  }
  func.func @transform_1(%arg0: i32) -> (i32, i32) {
    %c0_i32 = arith.constant 0 : i32
    %c0_i32_0 = arith.constant 0 : i32
    return %arg0, %c0_i32 : i32, i32
  }
}

</mosaic_0001>

<bundles_post_ra>
// kernel: tpu_custom_call.1
= control target key start
LH: loop header
LB: loop body
LE: loop exit
PB: predicated region body
PF: predicated region fallthrough
CT: control target
= control target key end

     0   :  { %6 = vsyncpa [#allocation3], 0  ;;  %s174_s0 = inlined_call_operand.hbm [shape: f32[1,2048], index: 0, kind: input, shape index: {}]   ;;  %s175_s1 = inlined_call_operand.hbm [shape: f32[1,2048], index: 1, kind: output, shape index: {}]  }
   0x1   :  { %7 = vsyncpa [#allocation4], 0  ;;  %s136_s6 = smov [#allocation2]   ;;  %s88_s10 = scalar_lea.hbm %s174_s0, 256 }
   0x2   :  { %s14_s7 = sshll.u32 %s136_s6, 4  ;;  %p89_p0 = scmp.ne.s32.totalorder %s174_s0, %s88_s10  ;;  %s15_s7 = int_to_ptr.vmem [resolvable:$true] %s14_s7 }
   0x3   :  { %p92_p1 = scmp.lt.u32.totalorder %s88_s10, %s174_s0 }
   0x5   :  { %p94_p2 = pnand %p92_p1, %p89_p0 }
   0x7   :  { %97 = shalt.err (!%p94_p2)
}
   0x8   :  { %s98_s15 = scalar_lea.vmem %s15_s7, 256  ;;  %p103_p4 = scmp.lt.s32.totalorder %s15_s7, %s15_s7 }
   0x9   :  { %p99_p3 = scmp.ne.s32.totalorder %s15_s7, %s98_s15  ;;  %p104_p5 = scmp.lt.s32.totalorder %s98_s15, %s98_s15 }
   0xb   :  { %p105_p6 = por %p104_p5, %p103_p4 }
   0xd   :  { %p106_p7 = pnand %p105_p6, %p99_p3 }
   0xf   :  { %109 = shalt.err (!%p106_p7)
}
  0x10   :  { %17 = dma.hbm_to_vmem [thread:$0]  %s174_s0, 256, %s15_s7, [#allocation3]  }
  0x11   :  { %132 = dma.done.wait [#allocation3], 256  }
  0x12   :  { %133 = vsyncadd [#allocation3], 4294967040  ;;  %v21_v0 = vld [vmem:[#allocation2] sm:$0xff]  ;;  %v22_v1 = vld [vmem:[#allocation2 + $0x8] sm:$0xff]  ;;  %s137_s0 = smov [#allocation5]  }
  0x13   :  { %v23_v2 = vand.u32 2147483647, %v21_v0  ;;  %v24_v3 = vand.u32 2147483647, %v22_v1  ;;  %vm31_vm0 = vcmp.ge.f32.partialorder %v21_v0, 0.0  ;;  %vm32_vm1 = vcmp.ge.f32.partialorder %v22_v1, 0.0 }
  0x14   :  { %s69_s18 = sshll.u32 %s137_s0, 4  ;;  %s70_s18 = int_to_ptr.vmem [resolvable:$true] %s69_s18 }
  0x15   :  { %v25_v4 = vsub.f32 0.0, %v23_v2  ;;  %v26_v5 = vsub.f32 0.0, %v24_v3  ;;  %s110_s19 = scalar_lea.vmem %s70_s18, 256  ;;  %p115_p9 = scmp.lt.s32.totalorder %s70_s18, %s70_s18 }
  0x16   :  { %p111_p8 = scmp.ne.s32.totalorder %s70_s18, %s110_s19  ;;  %p116_p10 = scmp.lt.s32.totalorder %s110_s19, %s110_s19 }
  0x17   :  { %v27_v6 = vmul.f32 1.442695, %v25_v4  ;;  %v29_v7 = vmul.f32 1.442695, %v26_v5 }
  0x18   :  { %p117_p11 = por %p116_p10, %p115_p9 }
  0x19   :  { %80 = vpow2.f32 %v27_v6 }
  0x1a   :  { %82 = vpow2.f32 %v29_v7  ;;  %p118_p12 = pnand %p117_p11, %p111_p8 }
  0x23   :  { %v81_v8 = vpop.eup %80 }
  0x24   :  { %v83_v9 = vpop.eup %82  ;;  %v33_v10 = vmul.f32 2.0, %v81_v8  ;;  %v47_v11 = vmul.f32 %v81_v8, %v81_v8  ;;  %v37_v25 = vadd.f32 2.0, %v81_v8 }
  0x25   :  { %v34_v12 = vmul.f32 2.0, %v83_v9  ;;  %v48_v13 = vmul.f32 %v83_v9, %v83_v9  ;;  %v38_v27 = vadd.f32 2.0, %v83_v9 }
  0x26   :  { %v35_v14 = vadd.f32 1.0, %v33_v10  ;;  %v43_v15 = vmul.f32 %v81_v8, %v33_v10  ;;  %v49_v16 = vadd.f32 %v47_v11, %v33_v10  ;;  %v39_v28 = vmul.f32 %v81_v8, %v37_v25 }
  0x27   :  { %v36_v17 = vadd.f32 1.0, %v34_v12  ;;  %v44_v18 = vmul.f32 %v83_v9, %v34_v12  ;;  %v50_v19 = vadd.f32 %v48_v13, %v34_v12  ;;  %v40_v29 = vmul.f32 %v83_v9, %v38_v27 }
  0x28   :  { %v45_v20 = vadd.f32 %v43_v15, %v35_v14  ;;  %v51_v21 = vadd.f32 2.0, %v49_v16  ;;  %v41_v30 = vsel %vm31_vm0, %v35_v14, %v39_v28 }
  0x29   :  { %v46_v22 = vadd.f32 %v44_v18, %v36_v17  ;;  %v52_v23 = vadd.f32 2.0, %v50_v19  ;;  %v42_v31 = vsel %vm32_vm1, %v36_v17, %v40_v29 }
  0x2a   :  { %v53_v24 = vsel %vm31_vm0, %v45_v20, %v51_v21 }
  0x2b   :  { %84 = vrcp.f32 %v53_v24  ;;  %v54_v26 = vsel %vm32_vm1, %v46_v22, %v52_v23 }
  0x2c   :  { %86 = vrcp.f32 %v54_v26 }
  0x35   :  { %v85_v32 = vpop.eup %84 }
  0x36   :  { %v87_v33 = vpop.eup %86  ;;  %v56_v34 = vmul.f32 %v85_v32, %v41_v30 }
  0x37   :  { %v58_v35 = vmul.f32 %v87_v33, %v42_v31 }
  0x38   :  { %v59_v36 = vmul.f32 %v56_v34, %v21_v0 }
  0x39   :  { %v60_v37 = vmul.f32 %v58_v35, %v22_v1 }
  0x3a   :  { %61 = vst [vmem:[#allocation5] sm:$0xff] %v59_v36 }
  0x3b   :  { %62 = vst [vmem:[#allocation5 + $0x8] sm:$0xff] %v60_v37 }
  0x3c   :  { %121 = shalt.err (!%p118_p12)
}
  0x3d   :  { %s122_s22 = scalar_lea.hbm %s175_s1, 256 }
  0x3e   :  { %p123_p13 = scmp.ne.s32.totalorder %s175_s1, %s122_s22  ;;  %p126_p0 = scmp.lt.u32.totalorder %s122_s22, %s175_s1 }
  0x40   :  { %p128_p1 = pnand %p126_p0, %p123_p13 }
  0x42   :  { %131 = shalt.err (!%p128_p1)
}
  0x43   :  { %72 = dma.vmem_to_hbm [thread:$0]  %s70_s18, 256, %s175_s1, [#allocation4]  }
  0x44   :  { %134 = dma.done.wait [#allocation4], 256  }
  0x45   :  { %135 = vsyncadd [#allocation4], 4294967040 }
  0x46   :  { %76 = vsyncpa [#allocation3], 1 }
  0x47   :  { %77 = vsyncpa [#allocation4], 1 }

</bundles_post_ra>
